<compile_context>
chip_gen: v6e
topology: v6e:2x2x1
jax: 0.10.0
libtpu: 0.0.40
codegen_flags: <defaults>
</compile_context>

<pallas_src>
import functools

import jax
import jax.numpy as jnp
from jax.experimental import pallas as pl
from jax.experimental.pallas import tpu as pltpu


def _round_up(n, m):
    return ((n + m - 1) // m) * m


def dqn_kernel(x_ref, w1_ref, b1_ref, w2_ref, b2_ref, w3_ref, b3_ref, o_ref):
    # In-kernel activation cast: f32 (as stored in HBM) -> bf16 for the MXU.
    x = x_ref[...].astype(jnp.bfloat16)
    # fc1 + ReLU   (bf16 operands, f32 accumulation)
    h1 = jnp.dot(x, w1_ref[...], preferred_element_type=jnp.float32)
    h1 = jnp.maximum(h1 + b1_ref[...], 0.0).astype(jnp.bfloat16)
    # fc2 + ReLU
    h2 = jnp.dot(h1, w2_ref[...], preferred_element_type=jnp.float32)
    h2 = jnp.maximum(h2 + b2_ref[...], 0.0).astype(jnp.bfloat16)
    # fc3 (no activation)
    out = jnp.dot(h2, w3_ref[...], preferred_element_type=jnp.float32)
    o_ref[...] = (out + b3_ref[...]).astype(o_ref.dtype)


@functools.partial(jax.jit, static_argnames=("tm",))
def dqn_forward(x, w1, b1, w2, b2, w3, b3, *, tm=2048):
    """x: (B, S) f32; w*: (in, out) f32; b*: (1, out) f32. Returns (B, A) f32."""
    B, S = x.shape
    H = w1.shape[1]
    A = w3.shape[1]
    assert H % 128 == 0, "hidden width must be a multiple of 128 for this kernel"

    # Minimal batch padding: round up to a sublane multiple only (deterministic rows).
    Bp = _round_up(B, 8)
    x_p = jnp.pad(x, ((0, Bp - B), (0, 0))) if Bp != B else x

    # Large batch tiles to amortize the ~0.35us per-step overhead; ragged last block OK
    # (OOB rows are row-local and their writes are dropped).
    tile_m = min(tm, Bp)
    n_steps = pl.cdiv(Bp, tile_m)
    # v7x has 2 TensorCores: for non-trivial batches make sure the "parallel" grid axis
    # has at least 2 steps so both cores get work (weights are duplicated, negligibly).
    if n_steps < 2 and Bp >= 16:
        tile_m = _round_up(pl.cdiv(Bp, 2), 8)
        n_steps = pl.cdiv(Bp, tile_m)
    grid = (n_steps,)

    # One-time tiny casts of the resident weights (bf16 MXU path); biases stay f32.
    w1_p = w1.astype(jnp.bfloat16)
    w2_p = w2.astype(jnp.bfloat16)
    w3_p = w3.astype(jnp.bfloat16)
    b1_p = b1.astype(jnp.float32)
    b2_p = b2.astype(jnp.float32)
    b3_p = b3.astype(jnp.float32)

    # Batch-tiled x / out; weights & biases resident in VMEM (constant block index).
    x_spec = pl.BlockSpec((tile_m, S), lambda i: (i, 0))
    w1_spec = pl.BlockSpec((S, H), lambda i: (0, 0))
    b1_spec = pl.BlockSpec((1, H), lambda i: (0, 0))
    w2_spec = pl.BlockSpec((H, H), lambda i: (0, 0))
    b2_spec = pl.BlockSpec((1, H), lambda i: (0, 0))
    w3_spec = pl.BlockSpec((H, A), lambda i: (0, 0))
    b3_spec = pl.BlockSpec((1, A), lambda i: (0, 0))
    o_spec = pl.BlockSpec((tile_m, A), lambda i: (i, 0))

    flops = 2 * Bp * (S * H + H * H + H * A)
    bytes_accessed = (
        Bp * S * 4                # x (f32, unpadded feature dim)
        + S * H * 2 + H * 4       # w1 (bf16), b1 (f32)
        + H * H * 2 + H * 4       # w2, b2
        + H * A * 2 + A * 4       # w3, b3
        + Bp * A * 4              # out (f32, unpadded action dim)
    )

    out = pl.pallas_call(
        dqn_kernel,
        out_shape=jax.ShapeDtypeStruct((Bp, A), jnp.float32),
        grid=grid,
        in_specs=[x_spec, w1_spec, b1_spec, w2_spec, b2_spec, w3_spec, b3_spec],
        out_specs=o_spec,
        compiler_params=pltpu.CompilerParams(
            dimension_semantics=("parallel",),
            # Double-buffered (tile_m, S)/(tile_m, A) tiles + ~66 KiB of resident
            # weights stay well under this even at tile_m=2048; safe on v7x's 64 MiB.
            vmem_limit_bytes=32 * 1024 * 1024,
        ),
        cost_estimate=pl.CostEstimate(
            flops=flops, transcendentals=0, bytes_accessed=bytes_accessed
        ),
    )(x_p, w1_p, b1_p, w2_p, b2_p, w3_p, b3_p)

    return out[:B] if Bp != B else out


def init_linear(key, in_features, out_features):
    # PyTorch nn.Linear default init: U(-1/sqrt(in), 1/sqrt(in)) for W and b.
    kw, kb = jax.random.split(key)
    bound = 1.0 / (in_features ** 0.5)
    # store W as (in, out) so kernel/reference compute x @ W  (== x @ W_torch.T)
    w = jax.random.uniform(kw, (in_features, out_features), jnp.float32, -bound, bound)
    b = jax.random.uniform(kb, (1, out_features), jnp.float32, -bound, bound)
    return w, b


def reference_forward(x, w1, b1, w2, b2, w3, b3):
    # Same mixed precision as the kernel: bf16 operands, f32 accumulation, f32 biases.
    bf = jnp.bfloat16
    h1 = jnp.dot(x.astype(bf), w1.astype(bf), preferred_element_type=jnp.float32) + b1
    h1 = jnp.maximum(h1, 0.0).astype(bf)
    h2 = jnp.dot(h1, w2.astype(bf), preferred_element_type=jnp.float32) + b2
    h2 = jnp.maximum(h2, 0.0).astype(bf)
    return jnp.dot(h2, w3.astype(bf), preferred_element_type=jnp.float32) + b3


if __name__ == "__main__":
    batch = 2
    state_size = 16
    action_size = 4
    hidden = 128

    key = jax.random.PRNGKey(0)
    kx, k1, k2, k3 = jax.random.split(key, 4)

    x = jax.random.normal(kx, (batch, state_size), jnp.float32)
    w1, b1 = init_linear(k1, state_size, hidden)
    w2, b2 = init_linear(k2, hidden, hidden)
    w3, b3 = init_linear(k3, hidden, action_size)

    out = dqn_forward(x, w1, b1, w2, b2, w3, b3)
    out = jax.block_until_ready(out)

    ref = reference_forward(x, w1, b1, w2, b2, w3, b3)
    assert out.shape == (batch, action_size)
    assert jnp.allclose(out, ref, atol=1e-2, rtol=1e-2), (out, ref)

    print("KERNEL_OK")
</pallas_src>

<mosaic_0001>
module attributes {stable_mosaic.version = 11 : i64} {
  func.func @dqn_kernel(%arg0: i32, %arg1: memref<8x16xf32, #tpu.memory_space<vmem>>, %arg2: memref<16x128xbf16, #tpu.memory_space<vmem>>, %arg3: memref<1x128xf32, #tpu.memory_space<vmem>>, %arg4: memref<128x128xbf16, #tpu.memory_space<vmem>>, %arg5: memref<1x128xf32, #tpu.memory_space<vmem>>, %arg6: memref<128x4xbf16, #tpu.memory_space<vmem>>, %arg7: memref<1x4xf32, #tpu.memory_space<vmem>>, %arg8: memref<8x4xf32, #tpu.memory_space<vmem>>) attributes {dimension_semantics = [#tpu.dimension_semantics<parallel>], iteration_bounds = array<i64: 1>, scalar_prefetch = 0 : i64, scratch_operands = 0 : i64, tpu.core_type = #tpu.core_type<tc>, window_params = [{transform_indices = @transform_0, window_bounds = array<i64: 8, 16>}, {pipeline_mode = #tpu.pipeline_mode<synchronous>, transform_indices = @transform_1, window_bounds = array<i64: 16, 128>}, {pipeline_mode = #tpu.pipeline_mode<synchronous>, transform_indices = @transform_2, window_bounds = array<i64: 1, 128>}, {pipeline_mode = #tpu.pipeline_mode<synchronous>, transform_indices = @transform_3, window_bounds = array<i64: 128, 128>}, {pipeline_mode = #tpu.pipeline_mode<synchronous>, transform_indices = @transform_4, window_bounds = array<i64: 1, 128>}, {pipeline_mode = #tpu.pipeline_mode<synchronous>, transform_indices = @transform_5, window_bounds = array<i64: 128, 4>}, {pipeline_mode = #tpu.pipeline_mode<synchronous>, transform_indices = @transform_6, window_bounds = array<i64: 1, 4>}, {transform_indices = @transform_7, window_bounds = array<i64: 8, 4>}]} {
    %c0 = arith.constant 0 : index
    %c0_0 = arith.constant 0 : index
    %0 = vector.load %arg1[%c0, %c0_0] : memref<8x16xf32, #tpu.memory_space<vmem>>, vector<8x16xf32>
    %1 = arith.truncf %0 : vector<8x16xf32> to vector<8x16xbf16>
    %c0_1 = arith.constant 0 : index
    %c0_2 = arith.constant 0 : index
    %2 = vector.load %arg2[%c0_1, %c0_2] : memref<16x128xbf16, #tpu.memory_space<vmem>>, vector<16x128xbf16>
    %cst = arith.constant dense<0.000000e+00> : vector<8x128xf32>
    %3 = tpu.matmul %1, %2, %cst {dimension_numbers = #tpu.dot_dimension_numbers<[1], [0], [0], [1], [0, 0, 1, 1], [], []>} : vector<8x16xbf16>, vector<16x128xbf16>, vector<8x128xf32> -> vector<8x128xf32>
    %c0_3 = arith.constant 0 : index
    %c0_4 = arith.constant 0 : index
    %4 = vector.load %arg3[%c0_3, %c0_4] : memref<1x128xf32, #tpu.memory_space<vmem>>, vector<1x128xf32>
    %5 = vector.broadcast %4 : vector<1x128xf32> to vector<8x128xf32>
    %6 = arith.addf %3, %5 : vector<8x128xf32>
    %cst_5 = arith.constant 0.000000e+00 : f32
    %7 = vector.broadcast %cst_5 : f32 to vector<8x128xf32>
    %8 = arith.maximumf %6, %7 : vector<8x128xf32>
    %9 = arith.truncf %8 : vector<8x128xf32> to vector<8x128xbf16>
    %c0_6 = arith.constant 0 : index
    %c0_7 = arith.constant 0 : index
    %10 = vector.load %arg4[%c0_6, %c0_7] : memref<128x128xbf16, #tpu.memory_space<vmem>>, vector<128x128xbf16>
    %cst_8 = arith.constant dense<0.000000e+00> : vector<8x128xf32>
    %11 = tpu.matmul %9, %10, %cst_8 {dimension_numbers = #tpu.dot_dimension_numbers<[1], [0], [0], [1], [0, 0, 1, 1], [], []>} : vector<8x128xbf16>, vector<128x128xbf16>, vector<8x128xf32> -> vector<8x128xf32>
    %c0_9 = arith.constant 0 : index
    %c0_10 = arith.constant 0 : index
    %12 = vector.load %arg5[%c0_9, %c0_10] : memref<1x128xf32, #tpu.memory_space<vmem>>, vector<1x128xf32>
    %13 = vector.broadcast %12 : vector<1x128xf32> to vector<8x128xf32>
    %14 = arith.addf %11, %13 : vector<8x128xf32>
    %cst_11 = arith.constant 0.000000e+00 : f32
    %15 = vector.broadcast %cst_11 : f32 to vector<8x128xf32>
    %16 = arith.maximumf %14, %15 : vector<8x128xf32>
    %17 = arith.truncf %16 : vector<8x128xf32> to vector<8x128xbf16>
    %c0_12 = arith.constant 0 : index
    %c0_13 = arith.constant 0 : index
    %18 = vector.load %arg6[%c0_12, %c0_13] : memref<128x4xbf16, #tpu.memory_space<vmem>>, vector<128x4xbf16>
    %cst_14 = arith.constant dense<0.000000e+00> : vector<8x4xf32>
    %19 = tpu.matmul %17, %18, %cst_14 {dimension_numbers = #tpu.dot_dimension_numbers<[1], [0], [0], [1], [0, 0, 1, 1], [], []>} : vector<8x128xbf16>, vector<128x4xbf16>, vector<8x4xf32> -> vector<8x4xf32>
    %c0_15 = arith.constant 0 : index
    %c0_16 = arith.constant 0 : index
    %20 = vector.load %arg7[%c0_15, %c0_16] : memref<1x4xf32, #tpu.memory_space<vmem>>, vector<1x4xf32>
    %21 = vector.broadcast %20 : vector<1x4xf32> to vector<8x4xf32>
    %22 = arith.addf %19, %21 : vector<8x4xf32>
    %c0_17 = arith.constant 0 : index
    %c0_18 = arith.constant 0 : index
    %23 = vector.load %arg8[%c0_17, %c0_18] : memref<8x4xf32, #tpu.memory_space<vmem>>, vector<8x4xf32>
    tpu.vector_store %arg8[%c0_17, %c0_18], %22 {strides = array<i32>} : memref<8x4xf32, #tpu.memory_space<vmem>>, vector<8x4xf32>,
    return
  }
  func.func @transform_0(%arg0: i32) -> (i32, i32) {
    %c0_i32 = arith.constant 0 : i32
    %c0_i32_0 = arith.constant 0 : i32
    return %arg0, %c0_i32 : i32, i32
  }
  func.func @transform_1(%arg0: i32) -> (i32, i32) {
    %c0_i32 = arith.constant 0 : i32
    %c0_i32_0 = arith.constant 0 : i32
    %c0_i32_1 = arith.constant 0 : i32
    return %c0_i32, %c0_i32_0 : i32, i32
  }
  func.func @transform_2(%arg0: i32) -> (i32, i32) {
    %c0_i32 = arith.constant 0 : i32
    %c0_i32_0 = arith.constant 0 : i32
    %c0_i32_1 = arith.constant 0 : i32
    return %c0_i32, %c0_i32_0 : i32, i32
  }
  func.func @transform_3(%arg0: i32) -> (i32, i32) {
    %c0_i32 = arith.constant 0 : i32
    %c0_i32_0 = arith.constant 0 : i32
    %c0_i32_1 = arith.constant 0 : i32
    return %c0_i32, %c0_i32_0 : i32, i32
  }
  func.func @transform_4(%arg0: i32) -> (i32, i32) {
    %c0_i32 = arith.constant 0 : i32
    %c0_i32_0 = arith.constant 0 : i32
    %c0_i32_1 = arith.constant 0 : i32
    return %c0_i32, %c0_i32_0 : i32, i32
  }
  func.func @transform_5(%arg0: i32) -> (i32, i32) {
    %c0_i32 = arith.constant 0 : i32
    %c0_i32_0 = arith.constant 0 : i32
    %c0_i32_1 = arith.constant 0 : i32
    return %c0_i32, %c0_i32_0 : i32, i32
  }
  func.func @transform_6(%arg0: i32) -> (i32, i32) {
    %c0_i32 = arith.constant 0 : i32
    %c0_i32_0 = arith.constant 0 : i32
    %c0_i32_1 = arith.constant 0 : i32
    return %c0_i32, %c0_i32_0 : i32, i32
  }
  func.func @transform_7(%arg0: i32) -> (i32, i32) {
    %c0_i32 = arith.constant 0 : i32
    %c0_i32_0 = arith.constant 0 : i32
    return %arg0, %c0_i32 : i32, i32
  }
}

</mosaic_0001>

<bundles_post_ra>
// kernel: dqn_forward.1
= control target key start
LH: loop header
LB: loop body
LE: loop exit
PB: predicated region body
PF: predicated region fallthrough
CT: control target
= control target key end

     0   :  { %v426_v0 = vmov 0.0   ;;  %vm427_vm0 = vmmov 0   ;;  %vm44_vm1 = vcmask 130048   ;;  %vm314_vm2 = vcmask 31744   ;;  %s554_s1 = inlined_call_operand.vmem [shape: bf16[16,128], index: 1, kind: input, shape index: {}]   ;;  %s555_s0 = inlined_call_operand.vmem [shape: f32[8,16], index: 0, kind: input, shape index: {}]   ;;  %s556_s3 = inlined_call_operand.vmem [shape: bf16[128,128], index: 3, kind: input, shape index: {}]   ;;  %s557_s5 = inlined_call_operand.vmem [shape: bf16[128,4], index: 5, kind: input, shape index: {}]   ;;  %s558_s2 = inlined_call_operand.vmem [shape: f32[1,128], index: 2, kind: input, shape index: {}]   ;;  %s559_s4 = inlined_call_operand.vmem [shape: f32[1,128], index: 4, kind: input, shape index: {}]   ;;  %s560_s6 = inlined_call_operand.vmem [shape: f32[1,4], index: 6, kind: input, shape index: {}]   ;;  %s561_s7 = inlined_call_operand.vmem [shape: f32[8,4], index: 7, kind: output, shape index: {}]  }
   0x1   :  { %361 = vmatprep.subr.bf16.mxu0 %v426_v0  ;;  %v409_v1 = vld [vmem:[%s554_s1] sm:$0xff]   ;;  %363 = vmatprep.mubr.msk.bf16.mxu0 %vm427_vm0, %v426_v0  ;;  %v410_v4 = vld [vmem:[%s556_s3 + $0x38] sm:$0xff]   ;;  %v411_v5 = vld [vmem:[%s556_s3 + $0x30] sm:$0xff]  }
   0x2   :  { %v27_v2 = vld [vmem:[%s555_s0] sm:$0xff]  ;;  %367 = vmatprep.subr.bf16.mxu1 %v426_v0  ;;  %383 = vmatprep.mubr.msk.bf16.mxu1 %vm427_vm0, %v426_v0  ;;  %v412_v6 = vld [vmem:[%s556_s3 + $0x28] sm:$0xff]   ;;  %v414_v8 = vld [vmem:[%s556_s3 + $0x18] sm:$0xff]  }
   0x3   :  { %362 = vmatpush3.bf16.msra.mxu0 %v409_v1  ;;  %v28_v3 = vpack.c.bf16 %v27_v2, %v27_v2  ;;  %368 = vmatpush3.bf16.msra.mxu1 %v410_v4  ;;  %v413_v7 = vld [vmem:[%s556_s3 + $0x20] sm:$0xff]   ;;  %v415_v9 = vld [vmem:[%s556_s3 + $0x10] sm:$0xff]   ;;  %v416_v10 = vld [vmem:[%s556_s3 + $0x8] sm:$0xff]  }
   0x4   :  { %387 = vmatprep.subr.bf16.mxu0 %v426_v0  ;;  %369 = vmatprep.subr.bf16.mxu1 %v426_v0  ;;  %v417_v11 = vld [vmem:[%s556_s3] sm:$0xff]   ;;  %v418_v12 = vld [vmem:[%s557_s5 + $0x38] sm:$0xff]   ;;  %v419_v13 = vld [vmem:[%s557_s5 + $0x30] sm:$0xff]  }
   0x5   :  { %v420_v14 = vld [vmem:[%s557_s5 + $0x28] sm:$0xff]   ;;  %v421_v15 = vld [vmem:[%s557_s5 + $0x20] sm:$0xff]   ;;  %v422_v16 = vld [vmem:[%s557_s5 + $0x18] sm:$0xff]  }
   0x6   :  { %364 = vmatmul.mubr.msk.bf16.vlgmr.msra.gmra.mxu0 %vm44_vm1, %v28_v3  ;;  %v423_v17 = vld [vmem:[%s557_s5 + $0x10] sm:$0xff]   ;;  %v320_v18 = vld [vmem:[%s558_s2] ss:$0 sm:$0xff]  ;;  %v424_v26 = vld [vmem:[%s557_s5 + $0x8] sm:$0xff]  }
   0x7   :  { %403 = vmatprep.mubr.msk.bf16.mxu0 %vm427_vm0, %v426_v0  ;;  %370 = vmatpush3.bf16.msra.mxu1 %v411_v5  ;;  %v425_v27 = vld [vmem:[%s557_s5] sm:$0xff]  }
   0x8   :  { %371 = vmatprep.subr.bf16.mxu1 %v426_v0  ;;  %388 = vmatpush3.bf16.msra.mxu0 %v418_v12  ;;  %v323_v28 = vld [vmem:[%s559_s4] ss:$0 sm:$0xff] }
   0x9   :  { %389 = vmatprep.subr.bf16.mxu0 %v426_v0  ;;  %v332_v36 = vld [vmem:[%s560_s6] ss:$0 sm:$0xff] }
   0xb   :  { %372 = vmatpush3.bf16.msra.mxu1 %v412_v6 }
   0xc   :  { %373 = vmatprep.subr.bf16.mxu1 %v426_v0  ;;  %390 = vmatpush3.bf16.msra.mxu0 %v419_v13 }
   0xd   :  { %391 = vmatprep.subr.bf16.mxu0 %v426_v0 }
   0xf   :  { %374 = vmatpush3.bf16.msra.mxu1 %v413_v7 }
  0x10   :  { %375 = vmatprep.subr.bf16.mxu1 %v426_v0  ;;  %392 = vmatpush3.bf16.msra.mxu0 %v420_v14 }
  0x11   :  { %393 = vmatprep.subr.bf16.mxu0 %v426_v0 }
  0x13   :  { %376 = vmatpush3.bf16.msra.mxu1 %v414_v8 }
  0x14   :  { %377 = vmatprep.subr.bf16.mxu1 %v426_v0  ;;  %394 = vmatpush3.bf16.msra.mxu0 %v421_v15 }
  0x15   :  { %395 = vmatprep.subr.bf16.mxu0 %v426_v0 }
  0x17   :  { %378 = vmatpush3.bf16.msra.mxu1 %v415_v9 }
  0x18   :  { %379 = vmatprep.subr.bf16.mxu1 %v426_v0  ;;  %396 = vmatpush3.bf16.msra.mxu0 %v422_v16 }
  0x19   :  { %397 = vmatprep.subr.bf16.mxu0 %v426_v0 }
  0x1b   :  { %380 = vmatpush3.bf16.msra.mxu1 %v416_v10 }
  0x1c   :  { %381 = vmatprep.subr.bf16.mxu1 %v426_v0  ;;  %398 = vmatpush3.bf16.msra.mxu0 %v423_v17 }
  0x1d   :  { %399 = vmatprep.subr.bf16.mxu0 %v426_v0 }
  0x1f   :  { %382 = vmatpush3.bf16.msra.mxu1 %v417_v11 }
  0x20   :  { %400 = vmatpush3.bf16.msra.mxu0 %v424_v26 }
  0x21   :  { %401 = vmatprep.subr.bf16.mxu0 %v426_v0 }
  0x24   :  { %402 = vmatpush3.bf16.msra.mxu0 %v425_v27 }
  0xc6   :  { %v82_v19 = vpop.f32.mrf.mxu0 }
  0xc7   :  { %v83_v20 = vadd.f32 %v320_v18, %v82_v19 }
  0xc8   :  { %v365_v21 = vpop.f32.mrf.mxu0 }
  0xc9   :  { %v88_v22 = vmax.f32 %v83_v20, 0.0 }
  0xca   :  { %v85_v23 = vpop.f32.mrf.mxu0 }
  0xcb   :  { %v89_v24 = vpack.c.bf16 %v88_v22, %v88_v22 }
  0xcc   :  { %v366_v25 = vpop.f32.mrf.mxu0 }
  0xcd   :  { %384 = vmatmul.mubr.bf16.vlgmr.msra.gmra.mxu1 %v89_v24 }
 0x18d   :  { %v195_v29 = vpop.f32.mrf.mxu1 }
 0x18e   :  { %v196_v30 = vadd.f32 %v323_v28, %v195_v29 }
 0x18f   :  { %v385_v31 = vpop.f32.mrf.mxu1 }
 0x190   :  { %v201_v32 = vmax.f32 %v196_v30, 0.0 }
 0x191   :  { %v198_v33 = vpop.f32.mrf.mxu1 }
 0x192   :  { %v202_v34 = vpack.c.bf16 %v201_v32, %v201_v32 }
 0x193   :  { %v386_v35 = vpop.f32.mrf.mxu1 }
 0x194   :  { %404 = vmatmul.mubr.bf16.vlgmr.msra.gmra.mxu0 %v202_v34 }
 0x254   :  { %v308_v37 = vpop.f32.mrf.mxu0 }
 0x255   :  { %v309_v38 = vadd.f32 %v332_v36, %v308_v37 }
 0x256   :  { %v405_v39 = vpop.f32.mrf.mxu0 }
 0x257   :  { %315 = vst.msk [vmem:[%s561_s7] sm:$0xff] %vm314_vm2, %v309_v38 }
 0x258   :  { %v311_v40 = vpop.f32.mrf.mxu0 }
 0x25a   :  { %v406_v41 = vpop.f32.mrf.mxu0 }

</bundles_post_ra>
